<compile_context>
chip_gen: v7x
topology: tpu7x:2x2x1
jax: 0.10.0
libtpu: 0.0.40
codegen_flags: <defaults>
</compile_context>

<pallas_src>
import jax
import jax.numpy as jnp
from jax.experimental import pallas as pl
from jax.experimental.pallas import tpu as pltpu

HIDDEN = 128                      # LSTM hidden size, fixed by the module
_VMEM_LIMIT = 48 * 1024 * 1024    # < v7x 64 MiB physical, > 32 MiB default


def _pick_tile(total, candidates):
    for c in candidates:
        if total % c == 0:
            return c
    return total


# ----------------------------------------------------------------------------
# Kernel A: (M,K) @ (K,N) + (1,N), tiled over M and N on a parallel grid.
# Used for the fused embedding/input-projection table and the output head.
# ----------------------------------------------------------------------------
def _matmul_bias_kernel(x_ref, w_ref, b_ref, o_ref):
    o_ref[...] = (jnp.dot(x_ref[...], w_ref[...],
                          preferred_element_type=jnp.float32)
                  + b_ref[...])


def matmul_bias(x, w, b):
    """(M,K) @ (K,N) + (1,N) -> (M,N) float32, M/N tiled on a parallel grid."""
    M, K = x.shape
    N = w.shape[1]
    tm = _pick_tile(M, (512, 256, 128, 64, 32, 16, 8))
    tn = _pick_tile(N, (1024, 512, 256, 128))
    # TODO(synk): add a K grid axis + f32 VMEM accumulator for very large K;
    # K here is either V (char-LM vocab) or H=128, so a full-K block is fine.
    return pl.pallas_call(
        _matmul_bias_kernel,
        out_shape=jax.ShapeDtypeStruct((M, N), jnp.float32),
        grid_spec=pltpu.PrefetchScalarGridSpec(
            num_scalar_prefetch=0,
            grid=(M // tm, N // tn),
            in_specs=[
                pl.BlockSpec((tm, K), lambda i, j: (i, 0)),
                pl.BlockSpec((K, tn), lambda i, j: (0, j)),
                pl.BlockSpec((1, tn), lambda i, j: (0, j)),
            ],
            out_specs=pl.BlockSpec((tm, tn), lambda i, j: (i, j)),
        ),
        compiler_params=pltpu.CompilerParams(
            dimension_semantics=("parallel", "parallel"),
            vmem_limit_bytes=_VMEM_LIMIT),
    )(x, w, b)


# ----------------------------------------------------------------------------
# Kernel B: the sequential 2-layer LSTM recurrence, chunked over T.
# Grid = (T // TT,) "arbitrary"; h/c states persist in VMEM scratch across
# grid steps, gates0-in / h1_seq-out chunks are pipelined by the BlockSpecs.
# ----------------------------------------------------------------------------
def _lstm_recurrence_kernel(gates0_ref, whh0_ref, wih1_ref, whh1_ref, b1_ref,
                            h1_seq_ref, h0_s, c0_s, h1_s, c1_s):
    H = HIDDEN
    TT = gates0_ref.shape[0]
    B = gates0_ref.shape[1]

    @pl.when(pl.program_id(0) == 0)
    def _():
        h0_s[...] = jnp.zeros_like(h0_s)
        c0_s[...] = jnp.zeros_like(c0_s)
        h1_s[...] = jnp.zeros_like(h1_s)
        c1_s[...] = jnp.zeros_like(c1_s)

    # Hoist the bias broadcast out of the loop (JAX does not CSE
    # broadcast_in_dim; re-broadcasting every timestep is pure waste).
    b1 = jnp.broadcast_to(b1_ref[...], (B, 4 * H))

    def cell(gates, c):
        # PyTorch gate order: i, f, g, o
        i = jax.nn.sigmoid(gates[:, 0:H])
        f = jax.nn.sigmoid(gates[:, H:2 * H])
        g = jnp.tanh(gates[:, 2 * H:3 * H])
        o = jax.nn.sigmoid(gates[:, 3 * H:4 * H])
        c_new = f * c + i * g
        return o * jnp.tanh(c_new), c_new

    def body(t, carry):
        h0, c0, h1, c1 = carry
        # Layer 0: x@Wih0^T + b0 is precomputed in gates0; only h@Whh0^T left.
        g0 = gates0_ref[t] + jnp.dot(h0, whh0_ref[...],
                                     preferred_element_type=jnp.float32)
        h0n, c0n = cell(g0, c0)
        # Layer 1: two K=128 dots (same MXU work as a fused K=256 dot on all
        # generations, but no per-timestep concat copy / vreg shuffle).
        g1 = (jnp.dot(h0n, wih1_ref[...], preferred_element_type=jnp.float32)
              + jnp.dot(h1, whh1_ref[...], preferred_element_type=jnp.float32)
              + b1)
        h1n, c1n = cell(g1, c1)
        h1_seq_ref[t] = h1n                       # lane-dense (B, 128) store
        return (h0n, c0n, h1n, c1n)

    carry = (h0_s[...], c0_s[...], h1_s[...], c1_s[...])
    # unroll=2: layer-0 of step t+1 overlaps layer-1 of step t (hides the
    # MXU-pop + sigmoid/tanh dependency chain at small batch).
    h0, c0, h1, c1 = jax.lax.fori_loop(0, TT, body, carry, unroll=2)
    h0_s[...] = h0
    c0_s[...] = c0
    h1_s[...] = h1
    c1_s[...] = c1


# ----------------------------------------------------------------------------
# Wrapper (glue: table precompute, gather, padding, head, loss)
# ----------------------------------------------------------------------------
def lstm_lm_forward(idx, params, targets=None):
    emb = params["emb"]                       # (V, V)
    B, T = idx.shape
    V = emb.shape[0]
    H = HIDDEN
    B_pad = ((B + 7) // 8) * 8                # f32 sublane height
    V_pad = ((V + 127) // 128) * 128          # lane-dense head output

    # Pre-transpose weights once so the kernels do plain x @ W.
    wih0_T = params["wih0"].T                 # (V, 4H)
    b0 = (params["bih0"] + params["bhh0"]).reshape(1, 4 * H)
    whh0_T = params["whh0"].T                 # (H, 4H)
    wih1_T = params["wih1"].T                 # (H, 4H)
    whh1_T = params["whh1"].T                 # (H, 4H)
    b1 = (params["bih1"] + params["bhh1"]).reshape(1, 4 * H)
    wout_T = params["wout"].T                 # (H, V)
    bout = params["bout"].reshape(1, V)
    if V_pad != V:
        wout_T = jnp.pad(wout_T, ((0, 0), (0, V_pad - V)))
        bout = jnp.pad(bout, ((0, 0), (0, V_pad - V)))

    # Phase 1: fused embedding + layer-0 input projection table.
    #   proj[v] = emb[v] @ Wih0^T + (b_ih0 + b_hh0)      -> (V, 4H)
    # Per-token layer-0 input gates become a cheap row gather (no (T,B,V)
    # slab, no V-wide matmul over T*B rows).
    proj = matmul_bias(emb, wih0_T, b0)                  # (V, 4H)
    gates0 = jnp.take(proj, idx.T, axis=0)               # (T, B, 4H) time-major
    if B_pad != B:
        gates0 = jnp.pad(gates0, ((0, 0), (0, B_pad - B), (0, 0)))

    # Phase 2: sequential recurrence, chunked over T so VMEM use is bounded
    # (v7x: 64 MiB physical) and chunk DMA overlaps the sequential compute.
    TT = 1
    chunk_budget = 8 * 1024 * 1024            # 2 buffers x (gates0 + h1) chunk
    for cand in (256, 128, 64, 32, 16, 8, 4, 2, 1):
        if T % cand == 0 and 2 * cand * B_pad * 5 * H * 4 <= chunk_budget:
            TT = cand
            break

    h1_seq = pl.pallas_call(
        _lstm_recurrence_kernel,
        out_shape=jax.ShapeDtypeStruct((T, B_pad, H), jnp.float32),
        grid_spec=pltpu.PrefetchScalarGridSpec(
            num_scalar_prefetch=0,
            grid=(T // TT,),
            in_specs=[
                pl.BlockSpec((TT, B_pad, 4 * H), lambda t: (t, 0, 0)),  # gates0
                pl.BlockSpec((H, 4 * H), lambda t: (0, 0)),             # whh0^T
                pl.BlockSpec((H, 4 * H), lambda t: (0, 0)),             # wih1^T
                pl.BlockSpec((H, 4 * H), lambda t: (0, 0)),             # whh1^T
                pl.BlockSpec((1, 4 * H), lambda t: (0, 0)),             # b1
            ],
            out_specs=pl.BlockSpec((TT, B_pad, H), lambda t: (t, 0, 0)),
            scratch_shapes=[pltpu.VMEM((B_pad, H), jnp.float32)] * 4,   # h0,c0,h1,c1
        ),
        compiler_params=pltpu.CompilerParams(
            dimension_semantics=("arbitrary",),
            vmem_limit_bytes=_VMEM_LIMIT),
    )(gates0, whh0_T, wih1_T, whh1_T, b1)

    # Phase 3: output head.  Transpose only the SMALL (T,B,H) hidden tensor to
    # batch-major, so the head writes logits directly in (B, T, V) layout and
    # no (B,T,V)-sized transpose is ever materialized.
    h1_bm = jnp.transpose(h1_seq, (1, 0, 2)).reshape(B_pad * T, H)
    logits_flat = matmul_bias(h1_bm, wout_T, bout)        # (B_pad*T, V_pad)
    logits = logits_flat.reshape(B_pad, T, V_pad)[:B, :, :V]   # (B, T, V)

    if targets is None:
        return logits, None

    # F.cross_entropy with mean reduction (glue in plain JAX).
    logits_2d = logits.reshape(B * T, V)
    targets_1d = targets.reshape(B * T)
    logp = jax.nn.log_softmax(logits_2d, axis=-1)
    loss = -jnp.mean(jnp.take_along_axis(logp, targets_1d[:, None], axis=1))
    return logits, loss


# ----------------------------------------------------------------------------
# Pure-JAX reference (numerical check against the kernels)
# ----------------------------------------------------------------------------
def reference_logits(idx, params):
    H = HIDDEN
    x = params["emb"][idx]  # (B, T, V)

    def run_layer(wih, whh, bih, bhh, xs):
        B = xs.shape[0]

        def step(carry, x_t):
            h, c = carry
            gates = x_t @ wih.T + h @ whh.T + bih + bhh
            i, f, g, o = jnp.split(gates, 4, axis=-1)
            i = jax.nn.sigmoid(i)
            f = jax.nn.sigmoid(f)
            g = jnp.tanh(g)
            o = jax.nn.sigmoid(o)
            c = f * c + i * g
            h = o * jnp.tanh(c)
            return (h, c), h

        init = (jnp.zeros((B, H), jnp.float32), jnp.zeros((B, H), jnp.float32))
        _, hs = jax.lax.scan(step, init, jnp.transpose(xs, (1, 0, 2)))
        return jnp.transpose(hs, (1, 0, 2))

    h0 = run_layer(params["wih0"], params["whh0"],
                   params["bih0"], params["bhh0"], x)
    h1 = run_layer(params["wih1"], params["whh1"],
                   params["bih1"], params["bhh1"], h0)
    return h1 @ params["wout"].T + params["bout"]


# ----------------------------------------------------------------------------
# Deterministic parameter init (shapes per nn.Module __init__)
# ----------------------------------------------------------------------------
def init_params(key, vocab_size):
    H = HIDDEN
    V = vocab_size
    ks = jax.random.split(key, 11)
    scale = 0.08  # ~ 1/sqrt(H), like PyTorch's default LSTM init range
    return {
        "emb":  jax.random.normal(ks[0], (V, V), jnp.float32) * 0.1,
        "wih0": jax.random.normal(ks[1], (4 * H, V), jnp.float32) * scale,
        "whh0": jax.random.normal(ks[2], (4 * H, H), jnp.float32) * scale,
        "bih0": jax.random.normal(ks[3], (4 * H,), jnp.float32) * scale,
        "bhh0": jax.random.normal(ks[4], (4 * H,), jnp.float32) * scale,
        "wih1": jax.random.normal(ks[5], (4 * H, H), jnp.float32) * scale,
        "whh1": jax.random.normal(ks[6], (4 * H, H), jnp.float32) * scale,
        "bih1": jax.random.normal(ks[7], (4 * H,), jnp.float32) * scale,
        "bhh1": jax.random.normal(ks[8], (4 * H,), jnp.float32) * scale,
        "wout": jax.random.normal(ks[9], (V, H), jnp.float32) * scale,
        "bout": jax.random.normal(ks[10], (V,), jnp.float32) * scale,
    }


if __name__ == "__main__":
    VOCAB = 32
    B, T = 2, 8

    root = jax.random.PRNGKey(0)
    k_params, k_idx, k_tgt = jax.random.split(root, 3)

    params = init_params(k_params, VOCAB)
    idx = jax.random.randint(k_idx, (B, T), 0, VOCAB, dtype=jnp.int32)
    targets = jax.random.randint(k_tgt, (B, T), 0, VOCAB, dtype=jnp.int32)

    logits, loss = lstm_lm_forward(idx, params, targets)
    logits = jax.block_until_ready(logits)
    loss = jax.block_until_ready(loss)

    assert logits.shape == (B, T, VOCAB)
    assert loss.shape == ()
    assert bool(jnp.isfinite(loss))

    ref = jax.block_until_ready(reference_logits(idx, params))
    assert jnp.allclose(logits, ref, atol=1e-4, rtol=1e-4), (
        float(jnp.max(jnp.abs(logits - ref))))

    print("KERNEL_OK")
</pallas_src>

<mosaic_0001>
module attributes {stable_mosaic.version = 11 : i64} {
  func.func @_matmul_bias_kernel(%arg0: i32, %arg1: i32, %arg2: memref<32x32xf32, #tpu.memory_space<vmem>>, %arg3: memref<32x512xf32, #tpu.memory_space<vmem>>, %arg4: memref<1x512xf32, #tpu.memory_space<vmem>>, %arg5: memref<32x512xf32, #tpu.memory_space<vmem>>) attributes {dimension_semantics = [#tpu.dimension_semantics<parallel>, #tpu.dimension_semantics<parallel>], iteration_bounds = array<i64: 1, 1>, scalar_prefetch = 0 : i64, scratch_operands = 0 : i64, tpu.core_type = #tpu.core_type<tc>, window_params = [{transform_indices = @transform_0, window_bounds = array<i64: 32, 32>}, {transform_indices = @transform_1, window_bounds = array<i64: 32, 512>}, {transform_indices = @transform_2, window_bounds = array<i64: 1, 512>}, {transform_indices = @transform_3, window_bounds = array<i64: 32, 512>}]} {
    %c0 = arith.constant 0 : index
    %c0_0 = arith.constant 0 : index
    %0 = vector.load %arg2[%c0, %c0_0] : memref<32x32xf32, #tpu.memory_space<vmem>>, vector<32x32xf32>
    %c0_1 = arith.constant 0 : index
    %c0_2 = arith.constant 0 : index
    %1 = vector.load %arg3[%c0_1, %c0_2] : memref<32x512xf32, #tpu.memory_space<vmem>>, vector<32x512xf32>
    %cst = arith.constant dense<0.000000e+00> : vector<32x512xf32>
    %2 = tpu.matmul %0, %1, %cst {dimension_numbers = #tpu.dot_dimension_numbers<[1], [0], [0], [1], [0, 0, 1, 1], [], []>} : vector<32x32xf32>, vector<32x512xf32>, vector<32x512xf32> -> vector<32x512xf32>
    %c0_3 = arith.constant 0 : index
    %c0_4 = arith.constant 0 : index
    %3 = vector.load %arg4[%c0_3, %c0_4] : memref<1x512xf32, #tpu.memory_space<vmem>>, vector<1x512xf32>
    %4 = vector.broadcast %3 : vector<1x512xf32> to vector<32x512xf32>
    %5 = arith.addf %2, %4 : vector<32x512xf32>
    %c0_5 = arith.constant 0 : index
    %c0_6 = arith.constant 0 : index
    %6 = vector.load %arg5[%c0_5, %c0_6] : memref<32x512xf32, #tpu.memory_space<vmem>>, vector<32x512xf32>
    tpu.vector_store %arg5[%c0_5, %c0_6], %5 {strides = array<i32>} : memref<32x512xf32, #tpu.memory_space<vmem>>, vector<32x512xf32>,
    return
  }
  func.func @transform_0(%arg0: i32, %arg1: i32) -> (i32, i32) {
    %c0_i32 = arith.constant 0 : i32
    %c0_i32_0 = arith.constant 0 : i32
    return %arg0, %c0_i32 : i32, i32
  }
  func.func @transform_1(%arg0: i32, %arg1: i32) -> (i32, i32) {
    %c0_i32 = arith.constant 0 : i32
    %c0_i32_0 = arith.constant 0 : i32
    return %c0_i32, %arg1 : i32, i32
  }
  func.func @transform_2(%arg0: i32, %arg1: i32) -> (i32, i32) {
    %c0_i32 = arith.constant 0 : i32
    %c0_i32_0 = arith.constant 0 : i32
    return %c0_i32, %arg1 : i32, i32
  }
  func.func @transform_3(%arg0: i32, %arg1: i32) -> (i32, i32) {
    %c0_i32 = arith.constant 0 : i32
    return %arg0, %arg1 : i32, i32
  }
}

</mosaic_0001>

<bundles_post_ra>
// kernel: tpu_custom_call.1
= control target key start
LH: loop header
LB: loop body
LE: loop exit
PB: predicated region body
PF: predicated region fallthrough
CT: control target
= control target key end

     0   :  { %8 = vsyncpa [#allocation3], 0  ;;  %s495_s0 = inlined_call_operand.hbm [shape: f32[32,32], index: 0, kind: input, shape index: {}]   ;;  %s496_s1 = inlined_call_operand.hbm [shape: f32[32,512], index: 1, kind: input, shape index: {}]   ;;  %s497_s2 = inlined_call_operand.vmem [shape: f32[1,512], index: 2, kind: input, shape index: {}]   ;;  %s498_s3 = inlined_call_operand.hbm [shape: f32[32,512], index: 3, kind: output, shape index: {}]  }
   0x1   :  { %9 = vsyncpa [#allocation6], 0 }
   0x2   :  { %10 = vsyncpa [#allocation4], 0  ;;  %s414_s12 = smov [#allocation2]   ;;  %s342_s16 = scalar_lea.hbm %s495_s0, 512 }
   0x3   :  { %s16_s13 = sshll.u32 %s414_s12, 4  ;;  %p343_p0 = scmp.ne.s32.totalorder %s495_s0, %s342_s16  ;;  %s17_s13 = int_to_ptr.vmem [resolvable:$true] %s16_s13 }
   0x4   :  { %p346_p1 = scmp.lt.u32.totalorder %s342_s16, %s495_s0 }
   0x6   :  { %p348_p2 = pnand %p346_p1, %p343_p0 }
   0x8   :  { %351 = shalt.err (!%p348_p2)
}
   0x9   :  { %s352_s21 = scalar_lea.vmem %s17_s13, 512  ;;  %p357_p4 = scmp.lt.s32.totalorder %s17_s13, %s17_s13 }
   0xa   :  { %p353_p3 = scmp.ne.s32.totalorder %s17_s13, %s352_s21  ;;  %p358_p5 = scmp.lt.s32.totalorder %s352_s21, %s352_s21 }
   0xc   :  { %p359_p6 = por %p358_p5, %p357_p4 }
   0xe   :  { %p360_p7 = pnand %p359_p6, %p353_p3 }
  0x10   :  { %363 = shalt.err (!%p360_p7)
}
  0x11   :  { %s415_s22 = smov 128   ;;  %s416_s23 = smov 8  }
  0x12   :  { %22 = dma.hbm_to_vmem [thread:$0]  %s495_s0, 512, %s17_s13, [#allocation3], %s415_s22, %s415_s22, %s416_s23  }
  0x13   :  { %s417_s26 = smov [#allocation5]   ;;  %s364_s30 = scalar_lea.hbm %s496_s1, 2048 }
  0x14   :  { %s28_s27 = sshll.u32 %s417_s26, 4  ;;  %p365_p8 = scmp.ne.s32.totalorder %s496_s1, %s364_s30  ;;  %s29_s27 = int_to_ptr.vmem [resolvable:$true] %s28_s27 }
  0x15   :  { %p368_p9 = scmp.lt.u32.totalorder %s364_s30, %s496_s1 }
  0x17   :  { %p370_p10 = pnand %p368_p9, %p365_p8 }
  0x19   :  { %373 = shalt.err (!%p370_p10)
}
  0x1a   :  { %s374_s8 = scalar_lea.vmem %s29_s27, 2048  ;;  %p379_p12 = scmp.lt.s32.totalorder %s29_s27, %s29_s27 }
  0x1b   :  { %p375_p11 = scmp.ne.s32.totalorder %s29_s27, %s374_s8  ;;  %p380_p13 = scmp.lt.s32.totalorder %s374_s8, %s374_s8 }
  0x1d   :  { %p381_p0 = por %p380_p13, %p379_p12 }
  0x1f   :  { %p382_p1 = pnand %p381_p0, %p375_p11 }
  0x21   :  { %385 = shalt.err (!%p382_p1)
}
  0x22   :  { %s418_s0 = smov 512   ;;  %s419_s9 = smov 32  }
  0x23   :  { %34 = dma.hbm_to_vmem [thread:$0]  %s496_s1, 2048, %s29_s27, [#allocation6], %s418_s0, %s418_s0, %s419_s9  }
  0x24   :  { %408 = dma.done.wait [#allocation3], 512  }
  0x25   :  { %409 = vsyncadd [#allocation3], 4294966784 }
  0x26   :  { %410 = dma.done.wait [#allocation6], 2048  }
  0x27   :  { %411 = vsyncadd [#allocation6], 4294965248  ;;  %v420_v0 = vmov 0.0   ;;  %v48_v1 = vld [vmem:[#allocation5 + $0x8] sm:$0xff]  ;;  %v50_v3 = vld [vmem:[#allocation5 + $0x18] sm:$0xff]  ;;  %vm85_vm0 = vcmask 261120   ;;  %v65_v29 = vlaneseq }
  0x28   :  { %162 = vmatprep.mubr.f32.mxu0 %v420_v0  ;;  %251 = vmatprep.mubr.f32.mxu1 %v420_v0  ;;  %v52_v2 = vld [vmem:[#allocation5 + $0x28] sm:$0xff]  ;;  %v54_v5 = vld [vmem:[#allocation5 + $0x38] sm:$0xff]  ;;  %v47_v6 = vld [vmem:[#allocation5] sm:$0xff] }
  0x29   :  { %v318_v4 = vpack.c.bf16 %v52_v2, %v48_v1  ;;  %v51_v7 = vld [vmem:[#allocation5 + $0x20] sm:$0xff]  ;;  %v326_v8 = vpack.c.bf16 %v54_v5, %v50_v3  ;;  %v49_v10 = vld [vmem:[#allocation5 + $0x10] sm:$0xff]  ;;  %v56_v12 = vld [vmem:[#allocation5 + $0x48] sm:$0xff]  ;;  %v66_v30 = vshrl.u32 %v65_v29, 7 }
  0x2a   :  { %v320_v9 = vpack.c.bf16 %v51_v7, %v47_v6  ;;  %v53_v11 = vld [vmem:[#allocation5 + $0x30] sm:$0xff]  ;;  %v60_v14 = vld [vmem:[#allocation5 + $0x68] sm:$0xff]  ;;  %v58_v15 = vld [vmem:[#allocation5 + $0x58] sm:$0xff] }
  0x2b   :  { %319 = vmatprep.subr.bf16.mxu0 %v318_v4  ;;  %v328_v13 = vpack.c.bf16 %v53_v11, %v49_v10  ;;  %v62_v16 = vld [vmem:[#allocation5 + $0x78] sm:$0xff]  ;;  %327 = vmatprep.subr.bf16.mxu1 %v326_v8  ;;  %v322_v17 = vpack.c.bf16 %v60_v14, %v56_v12  ;;  %v55_v19 = vld [vmem:[#allocation5 + $0x40] sm:$0xff]  ;;  %v57_v21 = vld [vmem:[#allocation5 + $0x50] sm:$0xff]  ;;  %v67_v31 = vsub.s32 0, %v66_v30  ;;  %v75_v33 = vsub.s32 2, %v66_v30 }
  0x2c   :  { %321 = vmatpush1.bf16.msra.mxu0 %v320_v9  ;;  %v330_v18 = vpack.c.bf16 %v62_v16, %v58_v15  ;;  %v59_v20 = vld [vmem:[#allocation5 + $0x60] sm:$0xff]  ;;  %v61_v23 = vld [vmem:[#allocation5 + $0x70] sm:$0xff]  ;;  %v44_v26 = vld [vmem:[#allocation2 + $0x8] sm:$0xff]  ;;  %v71_v34 = vsub.s32 1, %v66_v30  ;;  %v79_v35 = vsub.s32 3, %v66_v30 }
  0x2d   :  { %329 = vmatpush1.bf16.msra.mxu1 %v328_v13  ;;  %v324_v22 = vpack.c.bf16 %v59_v20, %v55_v19  ;;  %323 = vmatprep.subr.bf16.mxu0 %v322_v17  ;;  %v332_v24 = vpack.c.bf16 %v61_v23, %v57_v21  ;;  %v43_v25 = vld [vmem:[#allocation2] sm:$0xff]  ;;  %v45_v27 = vld [vmem:[#allocation2 + $0x10] sm:$0xff]  ;;  %v46_v28 = vld [vmem:[#allocation2 + $0x18] sm:$0xff] }
  0x2e   :  { %331 = vmatprep.subr.bf16.mxu1 %v330_v18  ;;  %v63_v32 = vld [vmem:[%s497_s2] sm:$0xf]  ;;  %s421_s2 = smov [#allocation7]  }
  0x2f   :  { %v68_v36 = vrot.slane %v63_v32, %v67_v31  ;;  %v76_v37 = vrot.slane %v63_v32, %v75_v33  ;;  %v72_v38 = vrot.slane %v63_v32, %v71_v34  ;;  %v80_v39 = vrot.slane %v63_v32, %v79_v35  ;;  %s297_s13 = sshll.u32 %s421_s2, 4  ;;  %s298_s13 = int_to_ptr.vmem [resolvable:$true] %s297_s13 }
  0x30   :  { %325 = vmatpush1.bf16.msra.mxu0 %v324_v22  ;;  %s386_s14 = scalar_lea.vmem %s298_s13, 2048  ;;  %p391_p3 = scmp.lt.s32.totalorder %s298_s13, %s298_s13 }
  0x31   :  { %333 = vmatpush1.bf16.msra.mxu1 %v332_v24  ;;  %p387_p2 = scmp.ne.s32.totalorder %s298_s13, %s386_s14  ;;  %p392_p4 = scmp.lt.s32.totalorder %s386_s14, %s386_s14 }
  0x33   :  { %310 = vmatmul.mubr.msk.f32.vlgmr.msra.gmra.mrb[0].mxu0 %vm85_vm0, %v43_v25  ;;  %p393_p5 = por %p392_p4, %p391_p3 }
  0x34   :  { %314 = vmatmul.mubr.msk.f32.vlgmr.msra.gmra.mrb[0].mxu1 %vm85_vm0, %v43_v25  ;;  %168 = vmatprep.mubr.f32.mxu0 %v420_v0 }
  0x35   :  { %257 = vmatprep.mubr.f32.mxu1 %v420_v0  ;;  %p394_p6 = pnand %p393_p5, %p387_p2 }
  0x37   :  { %311 = vmatmul.mubr.msk.f32.gmra.mrb[2].mxu0 %vm85_vm0, %v44_v26 }
  0x38   :  { %315 = vmatmul.mubr.msk.f32.gmra.mrb[2].mxu1 %vm85_vm0, %v44_v26  ;;  %174 = vmatprep.mubr.f32.mxu0 %v420_v0 }
  0x39   :  { %263 = vmatprep.mubr.f32.mxu1 %v420_v0 }
  0x3b   :  { %312 = vmatmul.mubr.msk.f32.gmra.mrb[4].mxu0 %vm85_vm0, %v45_v27 }
  0x3c   :  { %316 = vmatmul.mubr.msk.f32.gmra.mrb[4].mxu1 %vm85_vm0, %v45_v27  ;;  %180 = vmatprep.mubr.f32.mxu0 %v420_v0 }
  0x3d   :  { %269 = vmatprep.mubr.f32.mxu1 %v420_v0 }
  0x3f   :  { %313 = vmatmul.mubr.msk.f32.gmra.mrb[6].mxu0 %vm85_vm0, %v46_v28 }
  0x40   :  { %317 = vmatmul.mubr.msk.f32.gmra.mrb[6].mxu1 %vm85_vm0, %v46_v28 }
 0x106   :  { %v164_v40 = vpop.f32.mrb[0].mxu0 }
 0x107   :  { %v165_v41 = vadd.f32 %v164_v40, %v68_v36  ;;  %v253_v42 = vpop.f32.mrb[0].mxu1  ;;  %v166_v43 = vpop.f32.mrb[1].mxu0 }
 0x108   :  { %v254_v44 = vadd.f32 %v253_v42, %v76_v37  ;;  %v167_v45 = vadd.f32 %v166_v43, %v72_v38  ;;  %v255_v46 = vpop.f32.mrb[1].mxu1 }
 0x109   :  { %276 = vst [vmem:[#allocation7] sm:$0xff] %v165_v41  ;;  %v256_v47 = vadd.f32 %v255_v46, %v80_v39 }
 0x10a   :  { %278 = vst [vmem:[#allocation7 + $0x10] sm:$0xff] %v254_v44  ;;  %277 = vst [vmem:[#allocation7 + $0x8] sm:$0xff] %v167_v45  ;;  %v170_v48 = vpop.f32.mrb[2].mxu0 }
 0x10b   :  { %279 = vst [vmem:[#allocation7 + $0x18] sm:$0xff] %v256_v47  ;;  %v171_v49 = vadd.f32 %v170_v48, %v68_v36  ;;  %v259_v50 = vpop.f32.mrb[2].mxu1  ;;  %v172_v51 = vpop.f32.mrb[3].mxu0 }
 0x10c   :  { %v260_v52 = vadd.f32 %v259_v50, %v76_v37  ;;  %v173_v53 = vadd.f32 %v172_v51, %v72_v38  ;;  %v261_v54 = vpop.f32.mrb[3].mxu1 }
 0x10d   :  { %280 = vst [vmem:[#allocation7 + $0x20] sm:$0xff] %v171_v49  ;;  %v262_v55 = vadd.f32 %v261_v54, %v80_v39 }
 0x10e   :  { %282 = vst [vmem:[#allocation7 + $0x30] sm:$0xff] %v260_v52  ;;  %281 = vst [vmem:[#allocation7 + $0x28] sm:$0xff] %v173_v53  ;;  %v176_v56 = vpop.f32.mrb[4].mxu0 }
 0x10f   :  { %283 = vst [vmem:[#allocation7 + $0x38] sm:$0xff] %v262_v55  ;;  %v177_v57 = vadd.f32 %v176_v56, %v68_v36  ;;  %v265_v58 = vpop.f32.mrb[4].mxu1  ;;  %v178_v59 = vpop.f32.mrb[5].mxu0 }
 0x110   :  { %v266_v60 = vadd.f32 %v265_v58, %v76_v37  ;;  %v179_v61 = vadd.f32 %v178_v59, %v72_v38  ;;  %v267_v62 = vpop.f32.mrb[5].mxu1 }
 0x111   :  { %284 = vst [vmem:[#allocation7 + $0x40] sm:$0xff] %v177_v57  ;;  %v268_v63 = vadd.f32 %v267_v62, %v80_v39 }
 0x112   :  { %286 = vst [vmem:[#allocation7 + $0x50] sm:$0xff] %v266_v60  ;;  %285 = vst [vmem:[#allocation7 + $0x48] sm:$0xff] %v179_v61  ;;  %v182_v0 = vpop.f32.mrb[6].mxu0 }
 0x113   :  { %287 = vst [vmem:[#allocation7 + $0x58] sm:$0xff] %v268_v63  ;;  %v183_v1 = vadd.f32 %v182_v0, %v68_v36  ;;  %v271_v2 = vpop.f32.mrb[6].mxu1  ;;  %v184_v3 = vpop.f32.mrb[7].mxu0 }
 0x114   :  { %v272_v4 = vadd.f32 %v271_v2, %v76_v37  ;;  %v185_v5 = vadd.f32 %v184_v3, %v72_v38  ;;  %v273_v6 = vpop.f32.mrb[7].mxu1 }
 0x115   :  { %288 = vst [vmem:[#allocation7 + $0x60] sm:$0xff] %v183_v1  ;;  %v274_v7 = vadd.f32 %v273_v6, %v80_v39 }
 0x116   :  { %290 = vst [vmem:[#allocation7 + $0x70] sm:$0xff] %v272_v4  ;;  %289 = vst [vmem:[#allocation7 + $0x68] sm:$0xff] %v185_v5 }
 0x117   :  { %291 = vst [vmem:[#allocation7 + $0x78] sm:$0xff] %v274_v7 }
 0x118   :  { %397 = shalt.err (!%p394_p6)
}
 0x119   :  { %s398_s17 = scalar_lea.hbm %s498_s3, 2048 }
 0x11a   :  { %p399_p7 = scmp.ne.s32.totalorder %s498_s3, %s398_s17  ;;  %p402_p8 = scmp.lt.u32.totalorder %s398_s17, %s498_s3 }
 0x11c   :  { %p404_p9 = pnand %p402_p8, %p399_p7 }
 0x11e   :  { %407 = shalt.err (!%p404_p9)
}
 0x11f   :  { %303 = dma.vmem_to_hbm [thread:$0]  %s298_s13, 2048, %s498_s3, [#allocation4], %s418_s0, %s418_s0, %s419_s9  }
 0x120   :  { %412 = dma.done.wait [#allocation4], 2048  }
 0x121   :  { %413 = vsyncadd [#allocation4], 4294965248 }
 0x122   :  { %307 = vsyncpa [#allocation3], 1 }
 0x123   :  { %308 = vsyncpa [#allocation6], 1 }
 0x124   :  { %309 = vsyncpa [#allocation4], 1 }

</bundles_post_ra>
